<compile_context>
chip_gen: v7x
topology: tpu7x:2x2x1
jax: 0.10.0
libtpu: 0.0.40
codegen_flags: <defaults>
</compile_context>

<pallas_src>
import jax
import jax.numpy as jnp
from jax.experimental import pallas as pl
from jax.experimental.pallas import tpu as pltpu

_DIMS = (784, 25, 60, 38, 10)
_PAD = 128  # lane-dense padded width for hidden/output dims


def _mlp_kernel(x_ref,
                w1_ref, b1_ref,
                w2_ref, b2_ref,
                w3_ref, b3_ref,
                w4_ref, b4_ref,
                o_ref):
    # Fused 4-layer MLP on one batch tile.
    # In-kernel bf16 cast of x (hidden under the x DMA), bf16 MXU matmuls with f32
    # accumulation, f32 bias-add + ReLU, bf16 between layers, bf16 lane-dense store.
    x = x_ref[...].astype(jnp.bfloat16)

    h = jnp.dot(x, w1_ref[...], preferred_element_type=jnp.float32)
    h = jnp.maximum(h + b1_ref[...], 0.0).astype(jnp.bfloat16)

    h = jnp.dot(h, w2_ref[...], preferred_element_type=jnp.float32)
    h = jnp.maximum(h + b2_ref[...], 0.0).astype(jnp.bfloat16)

    h = jnp.dot(h, w3_ref[...], preferred_element_type=jnp.float32)
    h = jnp.maximum(h + b3_ref[...], 0.0).astype(jnp.bfloat16)

    h = jnp.dot(h, w4_ref[...], preferred_element_type=jnp.float32)
    o_ref[...] = (h + b4_ref[...]).astype(jnp.bfloat16)  # (tile, 128) unmasked store


def prepare_params(params):
    """One-time weight prep: cast w to bf16, b to f32, zero-pad hidden/out dims to 128.

    Call once and reuse the result; do NOT call per forward step (it re-emits the
    pad/set ops every call).  Zero padding is mathematically exact: padded ReLU
    lanes are ReLU(0)=0 and padded output lanes are 0 (sliced away by the wrapper).
    """
    out = {}
    for idx in range(4):
        d_in, d_out = _DIMS[idx], _DIMS[idx + 1]
        pin = d_in if idx == 0 else _PAD
        w = params[f"w{idx + 1}"].astype(jnp.bfloat16)
        b = params[f"b{idx + 1}"].astype(jnp.float32)
        wp = jnp.zeros((pin, _PAD), jnp.bfloat16).at[:d_in, :d_out].set(w)
        bp = jnp.zeros((1, _PAD), jnp.float32).at[:, :d_out].set(b)
        out[f"w{idx + 1}"] = wp
        out[f"b{idx + 1}"] = bp
    return out


def middle_train_nn_forward(x, prepared, *, tile_b=2048):
    """x: (B, 784) float array (f32 or bf16).  prepared: output of prepare_params()."""
    B, D_in = x.shape
    assert D_in == _DIMS[0]

    # Batch tile: multiple of 8 (or the full batch for tiny B), capped at tile_b and
    # at round_up_8(ceil(B/2)) so the parallel grid axis has >= 2 steps (v7x 2 TCs).
    if B <= 8:
        tile = B
    else:
        half = -(-B // 2)
        half = -(-half // 8) * 8
        tile = min(int(tile_b), half)
        tile = max(8, (tile // 8) * 8)
    grid = (pl.cdiv(B, tile),)

    w1, b1 = prepared["w1"], prepared["b1"]
    w2, b2 = prepared["w2"], prepared["b2"]
    w3, b3 = prepared["w3"], prepared["b3"]
    w4, b4 = prepared["w4"], prepared["b4"]

    def resident(arr):
        # Whole array, same block every grid step -> stays resident in VMEM (~0.4 MiB).
        return pl.BlockSpec(arr.shape, lambda i: (0, 0),
                            memory_space=pltpu.MemorySpace.VMEM)

    flops = 2 * B * sum(a * b for a, b in zip(_DIMS[:-1], _DIMS[1:]))
    weight_bytes = sum(int(a.size) * a.dtype.itemsize
                       for a in (w1, b1, w2, b2, w3, b3, w4, b4))
    bytes_accessed = (B * D_in * x.dtype.itemsize   # streamed x read
                      + B * _PAD * 2                # bf16 output write
                      + weight_bytes)

    out = pl.pallas_call(
        _mlp_kernel,
        out_shape=jax.ShapeDtypeStruct((B, _PAD), jnp.bfloat16),
        grid_spec=pltpu.PrefetchScalarGridSpec(
            num_scalar_prefetch=0,
            grid=grid,
            in_specs=[
                pl.BlockSpec((tile, D_in), lambda i: (i, 0)),  # streamed x tile
                resident(w1), resident(b1),
                resident(w2), resident(b2),
                resident(w3), resident(b3),
                resident(w4), resident(b4),
            ],
            out_specs=pl.BlockSpec((tile, _PAD), lambda i: (i, 0)),
        ),
        compiler_params=pltpu.CompilerParams(
            dimension_semantics=("parallel",),
            vmem_limit_bytes=32 * 1024 * 1024,
        ),
        cost_estimate=pl.CostEstimate(
            flops=flops, transcendentals=0, bytes_accessed=bytes_accessed),
    )(x, w1, b1, w2, b2, w3, b3, w4, b4)

    return out[:, :_DIMS[-1]].astype(jnp.float32)


def init_params(key):
    """Deterministic init mirroring nn.Linear shapes (weights stored as (in, out))."""
    params = {}
    for idx in range(4):
        d_in, d_out = _DIMS[idx], _DIMS[idx + 1]
        key, kw, kb = jax.random.split(key, 3)
        bound = 1.0 / jnp.sqrt(d_in)  # matches PyTorch Linear default uniform bound
        params[f"w{idx + 1}"] = jax.random.uniform(
            kw, (d_in, d_out), jnp.float32, -bound, bound)
        params[f"b{idx + 1}"] = jax.random.uniform(
            kb, (1, d_out), jnp.float32, -bound, bound)
    return params


def _reference_forward(x, params):
    h = x
    for idx in range(1, 4):
        h = jnp.maximum(h @ params[f"w{idx}"] + params[f"b{idx}"], 0.0)
    return h @ params["w4"] + params["b4"]


if __name__ == "__main__":
    key = jax.random.PRNGKey(0)
    key, kx = jax.random.split(key)

    B = 8
    x = jax.random.normal(kx, (B, 784), jnp.float32)
    params = init_params(key)

    prepared = jax.tree_util.tree_map(jax.block_until_ready,
                                      prepare_params(params))  # hoisted, one-time prep

    fwd = jax.jit(middle_train_nn_forward)
    out = fwd(x, prepared)
    out = jax.block_until_ready(out)

    ref = _reference_forward(x, params)
    assert out.shape == (B, 10)
    max_err = float(jnp.max(jnp.abs(out - ref)))
    assert jnp.allclose(out, ref, atol=5e-2, rtol=5e-2), (
        f"mismatch vs JAX reference (max abs err {max_err})")

    print("KERNEL_OK")
</pallas_src>

<mosaic_0001>
module attributes {stable_mosaic.version = 11 : i64} {
  func.func @_mlp_kernel(%arg0: i32, %arg1: memref<8x784xf32, #tpu.memory_space<vmem>>, %arg2: memref<784x128xbf16, #tpu.memory_space<vmem>>, %arg3: memref<1x128xf32, #tpu.memory_space<vmem>>, %arg4: memref<128x128xbf16, #tpu.memory_space<vmem>>, %arg5: memref<1x128xf32, #tpu.memory_space<vmem>>, %arg6: memref<128x128xbf16, #tpu.memory_space<vmem>>, %arg7: memref<1x128xf32, #tpu.memory_space<vmem>>, %arg8: memref<128x128xbf16, #tpu.memory_space<vmem>>, %arg9: memref<1x128xf32, #tpu.memory_space<vmem>>, %arg10: memref<8x128xbf16, #tpu.memory_space<vmem>>) attributes {dimension_semantics = [#tpu.dimension_semantics<parallel>], iteration_bounds = array<i64: 1>, scalar_prefetch = 0 : i64, scratch_operands = 0 : i64, tpu.core_type = #tpu.core_type<tc>, window_params = [{transform_indices = @transform_0, window_bounds = array<i64: 8, 784>}, {pipeline_mode = #tpu.pipeline_mode<synchronous>, transform_indices = @transform_1, window_bounds = array<i64: 784, 128>}, {pipeline_mode = #tpu.pipeline_mode<synchronous>, transform_indices = @transform_2, window_bounds = array<i64: 1, 128>}, {pipeline_mode = #tpu.pipeline_mode<synchronous>, transform_indices = @transform_3, window_bounds = array<i64: 128, 128>}, {pipeline_mode = #tpu.pipeline_mode<synchronous>, transform_indices = @transform_4, window_bounds = array<i64: 1, 128>}, {pipeline_mode = #tpu.pipeline_mode<synchronous>, transform_indices = @transform_5, window_bounds = array<i64: 128, 128>}, {pipeline_mode = #tpu.pipeline_mode<synchronous>, transform_indices = @transform_6, window_bounds = array<i64: 1, 128>}, {pipeline_mode = #tpu.pipeline_mode<synchronous>, transform_indices = @transform_7, window_bounds = array<i64: 128, 128>}, {pipeline_mode = #tpu.pipeline_mode<synchronous>, transform_indices = @transform_8, window_bounds = array<i64: 1, 128>}, {transform_indices = @transform_9, window_bounds = array<i64: 8, 128>}]} {
    %c0 = arith.constant 0 : index
    %c0_0 = arith.constant 0 : index
    %0 = vector.load %arg1[%c0, %c0_0] : memref<8x784xf32, #tpu.memory_space<vmem>>, vector<8x784xf32>
    %1 = arith.truncf %0 : vector<8x784xf32> to vector<8x784xbf16>
    %c0_1 = arith.constant 0 : index
    %c0_2 = arith.constant 0 : index
    %2 = vector.load %arg2[%c0_1, %c0_2] : memref<784x128xbf16, #tpu.memory_space<vmem>>, vector<784x128xbf16>
    %cst = arith.constant dense<0.000000e+00> : vector<8x128xf32>
    %3 = tpu.matmul %1, %2, %cst {dimension_numbers = #tpu.dot_dimension_numbers<[1], [0], [0], [1], [0, 0, 1, 1], [], []>} : vector<8x784xbf16>, vector<784x128xbf16>, vector<8x128xf32> -> vector<8x128xf32>
    %c0_3 = arith.constant 0 : index
    %c0_4 = arith.constant 0 : index
    %4 = vector.load %arg3[%c0_3, %c0_4] : memref<1x128xf32, #tpu.memory_space<vmem>>, vector<1x128xf32>
    %5 = vector.broadcast %4 : vector<1x128xf32> to vector<8x128xf32>
    %6 = arith.addf %3, %5 : vector<8x128xf32>
    %cst_5 = arith.constant 0.000000e+00 : f32
    %7 = vector.broadcast %cst_5 : f32 to vector<8x128xf32>
    %8 = arith.maximumf %6, %7 : vector<8x128xf32>
    %9 = arith.truncf %8 : vector<8x128xf32> to vector<8x128xbf16>
    %c0_6 = arith.constant 0 : index
    %c0_7 = arith.constant 0 : index
    %10 = vector.load %arg4[%c0_6, %c0_7] : memref<128x128xbf16, #tpu.memory_space<vmem>>, vector<128x128xbf16>
    %cst_8 = arith.constant dense<0.000000e+00> : vector<8x128xf32>
    %11 = tpu.matmul %9, %10, %cst_8 {dimension_numbers = #tpu.dot_dimension_numbers<[1], [0], [0], [1], [0, 0, 1, 1], [], []>} : vector<8x128xbf16>, vector<128x128xbf16>, vector<8x128xf32> -> vector<8x128xf32>
    %c0_9 = arith.constant 0 : index
    %c0_10 = arith.constant 0 : index
    %12 = vector.load %arg5[%c0_9, %c0_10] : memref<1x128xf32, #tpu.memory_space<vmem>>, vector<1x128xf32>
    %13 = vector.broadcast %12 : vector<1x128xf32> to vector<8x128xf32>
    %14 = arith.addf %11, %13 : vector<8x128xf32>
    %cst_11 = arith.constant 0.000000e+00 : f32
    %15 = vector.broadcast %cst_11 : f32 to vector<8x128xf32>
    %16 = arith.maximumf %14, %15 : vector<8x128xf32>
    %17 = arith.truncf %16 : vector<8x128xf32> to vector<8x128xbf16>
    %c0_12 = arith.constant 0 : index
    %c0_13 = arith.constant 0 : index
    %18 = vector.load %arg6[%c0_12, %c0_13] : memref<128x128xbf16, #tpu.memory_space<vmem>>, vector<128x128xbf16>
    %cst_14 = arith.constant dense<0.000000e+00> : vector<8x128xf32>
    %19 = tpu.matmul %17, %18, %cst_14 {dimension_numbers = #tpu.dot_dimension_numbers<[1], [0], [0], [1], [0, 0, 1, 1], [], []>} : vector<8x128xbf16>, vector<128x128xbf16>, vector<8x128xf32> -> vector<8x128xf32>
    %c0_15 = arith.constant 0 : index
    %c0_16 = arith.constant 0 : index
    %20 = vector.load %arg7[%c0_15, %c0_16] : memref<1x128xf32, #tpu.memory_space<vmem>>, vector<1x128xf32>
    %21 = vector.broadcast %20 : vector<1x128xf32> to vector<8x128xf32>
    %22 = arith.addf %19, %21 : vector<8x128xf32>
    %cst_17 = arith.constant 0.000000e+00 : f32
    %23 = vector.broadcast %cst_17 : f32 to vector<8x128xf32>
    %24 = arith.maximumf %22, %23 : vector<8x128xf32>
    %25 = arith.truncf %24 : vector<8x128xf32> to vector<8x128xbf16>
    %c0_18 = arith.constant 0 : index
    %c0_19 = arith.constant 0 : index
    %26 = vector.load %arg8[%c0_18, %c0_19] : memref<128x128xbf16, #tpu.memory_space<vmem>>, vector<128x128xbf16>
    %cst_20 = arith.constant dense<0.000000e+00> : vector<8x128xf32>
    %27 = tpu.matmul %25, %26, %cst_20 {dimension_numbers = #tpu.dot_dimension_numbers<[1], [0], [0], [1], [0, 0, 1, 1], [], []>} : vector<8x128xbf16>, vector<128x128xbf16>, vector<8x128xf32> -> vector<8x128xf32>
    %c0_21 = arith.constant 0 : index
    %c0_22 = arith.constant 0 : index
    %28 = vector.load %arg9[%c0_21, %c0_22] : memref<1x128xf32, #tpu.memory_space<vmem>>, vector<1x128xf32>
    %29 = vector.broadcast %28 : vector<1x128xf32> to vector<8x128xf32>
    %30 = arith.addf %27, %29 : vector<8x128xf32>
    %31 = arith.truncf %30 : vector<8x128xf32> to vector<8x128xbf16>
    %c0_23 = arith.constant 0 : index
    %c0_24 = arith.constant 0 : index
    %32 = vector.load %arg10[%c0_23, %c0_24] : memref<8x128xbf16, #tpu.memory_space<vmem>>, vector<8x128xbf16>
    tpu.vector_store %arg10[%c0_23, %c0_24], %31 {strides = array<i32>} : memref<8x128xbf16, #tpu.memory_space<vmem>>, vector<8x128xbf16>,
    return
  }
  func.func @transform_0(%arg0: i32) -> (i32, i32) {
    %c0_i32 = arith.constant 0 : i32
    %c0_i32_0 = arith.constant 0 : i32
    return %arg0, %c0_i32 : i32, i32
  }
  func.func @transform_1(%arg0: i32) -> (i32, i32) {
    %c0_i32 = arith.constant 0 : i32
    %c0_i32_0 = arith.constant 0 : i32
    %c0_i32_1 = arith.constant 0 : i32
    return %c0_i32, %c0_i32_0 : i32, i32
  }
  func.func @transform_2(%arg0: i32) -> (i32, i32) {
    %c0_i32 = arith.constant 0 : i32
    %c0_i32_0 = arith.constant 0 : i32
    %c0_i32_1 = arith.constant 0 : i32
    return %c0_i32, %c0_i32_0 : i32, i32
  }
  func.func @transform_3(%arg0: i32) -> (i32, i32) {
    %c0_i32 = arith.constant 0 : i32
    %c0_i32_0 = arith.constant 0 : i32
    %c0_i32_1 = arith.constant 0 : i32
    return %c0_i32, %c0_i32_0 : i32, i32
  }
  func.func @transform_4(%arg0: i32) -> (i32, i32) {
    %c0_i32 = arith.constant 0 : i32
    %c0_i32_0 = arith.constant 0 : i32
    %c0_i32_1 = arith.constant 0 : i32
    return %c0_i32, %c0_i32_0 : i32, i32
  }
  func.func @transform_5(%arg0: i32) -> (i32, i32) {
    %c0_i32 = arith.constant 0 : i32
    %c0_i32_0 = arith.constant 0 : i32
    %c0_i32_1 = arith.constant 0 : i32
    return %c0_i32, %c0_i32_0 : i32, i32
  }
  func.func @transform_6(%arg0: i32) -> (i32, i32) {
    %c0_i32 = arith.constant 0 : i32
    %c0_i32_0 = arith.constant 0 : i32
    %c0_i32_1 = arith.constant 0 : i32
    return %c0_i32, %c0_i32_0 : i32, i32
  }
  func.func @transform_7(%arg0: i32) -> (i32, i32) {
    %c0_i32 = arith.constant 0 : i32
    %c0_i32_0 = arith.constant 0 : i32
    %c0_i32_1 = arith.constant 0 : i32
    return %c0_i32, %c0_i32_0 : i32, i32
  }
  func.func @transform_8(%arg0: i32) -> (i32, i32) {
    %c0_i32 = arith.constant 0 : i32
    %c0_i32_0 = arith.constant 0 : i32
    %c0_i32_1 = arith.constant 0 : i32
    return %c0_i32, %c0_i32_0 : i32, i32
  }
  func.func @transform_9(%arg0: i32) -> (i32, i32) {
    %c0_i32 = arith.constant 0 : i32
    %c0_i32_0 = arith.constant 0 : i32
    return %arg0, %c0_i32 : i32, i32
  }
}

</mosaic_0001>

<bundles_post_ra>
// kernel: middle_train_nn_forward.1
= control target key start
LH: loop header
LB: loop body
LE: loop exit
PB: predicated region body
PF: predicated region fallthrough
CT: control target
= control target key end

     0   :  { %14 = vsyncpa [#allocation3], 0  ;;  %s1640_s0 = inlined_call_operand.hbm [shape: f32[8,784], index: 0, kind: input, shape index: {}]   ;;  %s1641_s1 = inlined_call_operand.hbm [shape: bf16[784,128], index: 1, kind: input, shape index: {}]   ;;  %s1642_s2 = inlined_call_operand.vmem [shape: f32[1,128], index: 2, kind: input, shape index: {}]   ;;  %s1643_s3 = inlined_call_operand.hbm [shape: bf16[128,128], index: 3, kind: input, shape index: {}]   ;;  %s1644_s4 = inlined_call_operand.vmem [shape: f32[1,128], index: 4, kind: input, shape index: {}]   ;;  %s1645_s5 = inlined_call_operand.hbm [shape: bf16[128,128], index: 5, kind: input, shape index: {}]   ;;  %s1646_s6 = inlined_call_operand.vmem [shape: f32[1,128], index: 6, kind: input, shape index: {}]   ;;  %s1647_s7 = inlined_call_operand.hbm [shape: bf16[128,128], index: 7, kind: input, shape index: {}]   ;;  %s1648_s8 = inlined_call_operand.vmem [shape: f32[1,128], index: 8, kind: input, shape index: {}]   ;;  %s1649_s9 = inlined_call_operand.vmem [shape: bf16[8,128], index: 9, kind: output, shape index: {}]  }
   0x1   :  { %15 = vsyncpa [#allocation5], 0 }
   0x2   :  { %16 = vsyncpa [#allocation8], 0  ;;  %s1461_s30 = smov [#allocation4]   ;;  %s1345_s13 = scalar_lea.hbm %s1641_s1, 6272 }
   0x3   :  { %s32_s10 = sshll.u32 %s1461_s30, 4  ;;  %p1346_p0 = scmp.ne.s32.totalorder %s1641_s1, %s1345_s13  ;;  %s33_s10 = int_to_ptr.vmem [resolvable:$true] %s32_s10 }
   0x4   :  { %p1349_p1 = scmp.lt.u32.totalorder %s1345_s13, %s1641_s1 }
   0x6   :  { %p1351_p2 = pnand %p1349_p1, %p1346_p0 }
   0x8   :  { %1354 = shalt.err (!%p1351_p2)
}
   0x9   :  { %s1355_s18 = scalar_lea.vmem %s33_s10, 6272  ;;  %p1360_p4 = scmp.lt.s32.totalorder %s33_s10, %s33_s10 }
   0xa   :  { %p1356_p3 = scmp.ne.s32.totalorder %s33_s10, %s1355_s18  ;;  %p1361_p5 = scmp.lt.s32.totalorder %s1355_s18, %s1355_s18 }
   0xc   :  { %p1362_p6 = por %p1361_p5, %p1360_p4 }
   0xe   :  { %p1363_p7 = pnand %p1362_p6, %p1356_p3 }
  0x10   :  { %1366 = shalt.err (!%p1363_p7)
}
  0x11   :  { %s1462_s19 = smov 64   ;;  %s1463_s20 = smov 4  }
  0x12   :  { %38 = dma.hbm_to_vmem [thread:$0]  %s1641_s1, 6272, %s33_s10, [#allocation5], %s1462_s19, %s1462_s19, %s1463_s20  }
  0x13   :  { %s1464_s23 = smov [#allocation7]   ;;  %s1465_s25 = smov [#allocation2]  }
  0x14   :  { %s60_s24 = sshll.u32 %s1464_s23, 4  ;;  %s23_s26 = sshll.u32 %s1465_s25, 4  ;;  %s61_s24 = int_to_ptr.vmem [resolvable:$true] %s60_s24  ;;  %s24_s26 = int_to_ptr.vmem [resolvable:$true] %s23_s26 }
  0x15   :  { %s1367_s29 = scalar_lea.hbm %s1645_s5, 1024 }
  0x16   :  { %p1368_p8 = scmp.ne.s32.totalorder %s1645_s5, %s1367_s29  ;;  %p1371_p9 = scmp.lt.u32.totalorder %s1367_s29, %s1645_s5 }
  0x18   :  { %p1373_p10 = pnand %p1371_p9, %p1368_p8 }
  0x1a   :  { %1376 = shalt.err (!%p1373_p10)
}
  0x1b   :  { %s1377_s1 = scalar_lea.vmem %s61_s24, 1024  ;;  %p1382_p12 = scmp.lt.s32.totalorder %s61_s24, %s61_s24 }
  0x1c   :  { %p1378_p11 = scmp.ne.s32.totalorder %s61_s24, %s1377_s1  ;;  %p1383_p13 = scmp.lt.s32.totalorder %s1377_s1, %s1377_s1 }
  0x1e   :  { %p1384_p0 = por %p1383_p13, %p1382_p12 }
  0x20   :  { %p1385_p1 = pnand %p1384_p0, %p1378_p11 }
  0x22   :  { %1388 = shalt.err (!%p1385_p1)
}
  0x23   :  { %66 = dma.hbm_to_vmem [thread:$0]  %s1645_s5, 1024, %s61_s24, [#allocation8], %s1462_s19, %s1462_s19, %s1463_s20  }
  0x24   :  { %s1389_s17 = scalar_lea.hbm %s1640_s0, 896 }
  0x25   :  { %p1390_p2 = scmp.ne.s32.totalorder %s1640_s0, %s1389_s17  ;;  %p1393_p3 = scmp.lt.u32.totalorder %s1389_s17, %s1640_s0 }
  0x27   :  { %p1395_p4 = pnand %p1393_p3, %p1390_p2 }
  0x29   :  { %1398 = shalt.err (!%p1395_p4)
}
  0x2a   :  { %s1399_s25 = scalar_lea.vmem %s24_s26, 896  ;;  %p1404_p6 = scmp.lt.s32.totalorder %s24_s26, %s24_s26 }
  0x2b   :  { %p1400_p5 = scmp.ne.s32.totalorder %s24_s26, %s1399_s25  ;;  %p1405_p7 = scmp.lt.s32.totalorder %s1399_s25, %s1399_s25 }
  0x2d   :  { %p1406_p8 = por %p1405_p7, %p1404_p6 }
  0x2f   :  { %p1407_p9 = pnand %p1406_p8, %p1400_p5 }
  0x31   :  { %1410 = shalt.err (!%p1407_p9)
}
  0x32   :  { %26 = dma.hbm_to_vmem [thread:$0]  %s1640_s0, 896, %s24_s26, [#allocation3]  }
  0x33   :  { %s1466_s27 = smov [#allocation6]   ;;  %s1467_s29 = smov [#allocation9]  }
  0x34   :  { %s46_s28 = sshll.u32 %s1466_s27, 4  ;;  %s74_s30 = sshll.u32 %s1467_s29, 4  ;;  %s47_s28 = int_to_ptr.vmem [resolvable:$true] %s46_s28  ;;  %s75_s30 = int_to_ptr.vmem [resolvable:$true] %s74_s30 }
  0x35   :  { %s1411_s13 = scalar_lea.hbm %s1643_s3, 1024 }
  0x36   :  { %p1412_p10 = scmp.ne.s32.totalorder %s1643_s3, %s1411_s13  ;;  %p1415_p11 = scmp.lt.u32.totalorder %s1411_s13, %s1643_s3 }
  0x38   :  { %p1417_p12 = pnand %p1415_p11, %p1412_p10 }
  0x3a   :  { %1420 = shalt.err (!%p1417_p12)
}
  0x3b   :  { %s1421_s0 = scalar_lea.vmem %s47_s28, 1024  ;;  %p1426_p0 = scmp.lt.s32.totalorder %s47_s28, %s47_s28 }
  0x3c   :  { %p1422_p13 = scmp.ne.s32.totalorder %s47_s28, %s1421_s0  ;;  %p1427_p1 = scmp.lt.s32.totalorder %s1421_s0, %s1421_s0 }
  0x3e   :  { %p1428_p2 = por %p1427_p1, %p1426_p0 }
  0x40   :  { %p1429_p3 = pnand %p1428_p2, %p1422_p13 }
  0x42   :  { %1432 = shalt.err (!%p1429_p3)
}
  0x43   :  { %52 = dma.hbm_to_vmem [thread:$0]  %s1643_s3, 1024, %s47_s28, [#allocation5], %s1462_s19, %s1462_s19, %s1463_s20  }
  0x44   :  { %s1433_s21 = scalar_lea.hbm %s1647_s7, 1024 }
  0x45   :  { %p1434_p4 = scmp.ne.s32.totalorder %s1647_s7, %s1433_s21  ;;  %p1437_p5 = scmp.lt.u32.totalorder %s1433_s21, %s1647_s7 }
  0x47   :  { %p1439_p6 = pnand %p1437_p5, %p1434_p4 }
  0x49   :  { %1442 = shalt.err (!%p1439_p6)
}
  0x4a   :  { %s1443_s24 = scalar_lea.vmem %s75_s30, 1024  ;;  %p1448_p8 = scmp.lt.s32.totalorder %s75_s30, %s75_s30 }
  0x4b   :  { %p1444_p7 = scmp.ne.s32.totalorder %s75_s30, %s1443_s24  ;;  %p1449_p9 = scmp.lt.s32.totalorder %s1443_s24, %s1443_s24 }
  0x4d   :  { %p1450_p10 = por %p1449_p9, %p1448_p8 }
  0x4f   :  { %p1451_p11 = pnand %p1450_p10, %p1444_p7 }
  0x51   :  { %1454 = shalt.err (!%p1451_p11)
}
  0x52   :  { %80 = dma.hbm_to_vmem [thread:$0]  %s1647_s7, 1024, %s75_s30, [#allocation8], %s1462_s19, %s1462_s19, %s1463_s20  }
  0x53   :  { %1455 = dma.done.wait [#allocation3], 896  }
  0x54   :  { %1456 = vsyncadd [#allocation3], 4294966400 }
  0x55   :  { %1457 = dma.done.wait [#allocation5], 7296  }
  0x56   :  { %1458 = vsyncadd [#allocation5], 4294960000 }
  0x57   :  { %1459 = dma.done.wait [#allocation8], 2048  }
  0x58   :  { %1460 = vsyncadd [#allocation8], 4294965248  ;;  %v1272_v0 = vld [vmem:[#allocation4 + $0x40] sm:$0xff]   ;;  %v1276_v4 = vld [vmem:[#allocation4 + $0x48] sm:$0xff]   ;;  %v1468_v44 = vmov 0.0   ;;  %vm1469_vm0 = vmmov 0  }
  0x59   :  { %v1273_v1 = vld [vmem:[#allocation4] sm:$0xff]   ;;  %1102 = vmatprep.subr.bf16.mxu0 %v1272_v0  ;;  %v1277_v5 = vld [vmem:[#allocation4 + $0x8] sm:$0xff]   ;;  %v1280_v8 = vld [vmem:[#allocation4 + $0x50] sm:$0xff]   ;;  %vm512_vm1 = vcmask 130048  }
  0x5a   :  { %v1274_v2 = vld [vmem:[#allocation4 + $0xc0] sm:$0xff]   ;;  %1103 = vmatpush3.bf16.msra.mxu0 %v1273_v1  ;;  %v1278_v6 = vld [vmem:[#allocation4 + $0xc8] sm:$0xff]   ;;  %v1281_v9 = vld [vmem:[#allocation4 + $0x10] sm:$0xff]  }
  0x5b   :  { %v1275_v3 = vld [vmem:[#allocation4 + $0x80] sm:$0xff]   ;;  %1124 = vmatprep.subr.bf16.mxu1 %v1274_v2  ;;  %1104 = vmatprep.subr.bf16.mxu0 %v1276_v4  ;;  %v1279_v7 = vld [vmem:[#allocation4 + $0x88] sm:$0xff]   ;;  %v1282_v10 = vld [vmem:[#allocation4 + $0xd0] sm:$0xff]  }
  0x5c   :  { %1125 = vmatpush3.bf16.msra.mxu1 %v1275_v3  ;;  %v1283_v11 = vld [vmem:[#allocation4 + $0x90] sm:$0xff]   ;;  %v1284_v12 = vld [vmem:[#allocation4 + $0x58] sm:$0xff]   ;;  %v1288_v16 = vld [vmem:[#allocation4 + $0x60] sm:$0xff]  }
  0x5d   :  { %1126 = vmatprep.subr.bf16.mxu1 %v1278_v6  ;;  %v1285_v13 = vld [vmem:[#allocation4 + $0x18] sm:$0xff]   ;;  %v1289_v17 = vld [vmem:[#allocation4 + $0x20] sm:$0xff]   ;;  %v1292_v20 = vld [vmem:[#allocation4 + $0x68] sm:$0xff]  }
  0x5e   :  { %1105 = vmatpush3.bf16.msra.mxu0 %v1277_v5  ;;  %v1286_v14 = vld [vmem:[#allocation4 + $0xd8] sm:$0xff]   ;;  %v1290_v18 = vld [vmem:[#allocation4 + $0xe0] sm:$0xff]   ;;  %v1293_v21 = vld [vmem:[#allocation4 + $0x28] sm:$0xff]  }
  0x5f   :  { %1106 = vmatprep.subr.bf16.mxu0 %v1280_v8  ;;  %v1287_v15 = vld [vmem:[#allocation4 + $0x98] sm:$0xff]   ;;  %v1291_v19 = vld [vmem:[#allocation4 + $0xa0] sm:$0xff]   ;;  %v1294_v22 = vld [vmem:[#allocation4 + $0xe8] sm:$0xff]  }
  0x60   :  { %1127 = vmatpush3.bf16.msra.mxu1 %v1279_v7  ;;  %v1295_v23 = vld [vmem:[#allocation4 + $0xa8] sm:$0xff]   ;;  %v1296_v24 = vld [vmem:[#allocation4 + $0x70] sm:$0xff]   ;;  %v1300_v28 = vld [vmem:[#allocation4 + $0x78] sm:$0xff]  }
  0x61   :  { %1128 = vmatprep.subr.bf16.mxu1 %v1282_v10  ;;  %v1297_v25 = vld [vmem:[#allocation4 + $0x30] sm:$0xff]   ;;  %v1301_v29 = vld [vmem:[#allocation4 + $0x38] sm:$0xff]   ;;  %v99_v34 = vld [vmem:[#allocation2] sm:$0xff] }
  0x62   :  { %1107 = vmatpush3.bf16.msra.mxu0 %v1281_v9  ;;  %v1298_v26 = vld [vmem:[#allocation4 + $0xf0] sm:$0xff]   ;;  %v1302_v30 = vld [vmem:[#allocation4 + $0xf8] sm:$0xff]   ;;  %v106_v35 = vpack.c.bf16 %v99_v34, %v99_v34  ;;  %v1304_v36 = vld [vmem:[#allocation4 + $0x140] sm:$0xff]  }
  0x63   :  { %1108 = vmatprep.subr.bf16.mxu0 %v1284_v12  ;;  %v1299_v27 = vld [vmem:[#allocation4 + $0xb0] sm:$0xff]   ;;  %v1303_v33 = vld [vmem:[#allocation4 + $0xb8] sm:$0xff]   ;;  %v102_v37 = vld [vmem:[#allocation2 + $0x18] sm:$0xff] }
  0x64   :  { %1129 = vmatpush3.bf16.msra.mxu1 %v1283_v11  ;;  %v100_v31 = vld [vmem:[#allocation2 + $0x8] sm:$0xff]  ;;  %v109_v38 = vpack.c.bf16 %v102_v37, %v102_v37  ;;  %v1305_v39 = vld [vmem:[#allocation4 + $0x100] sm:$0xff]   ;;  %v101_v40 = vld [vmem:[#allocation2 + $0x10] sm:$0xff] }
  0x65   :  { %1130 = vmatprep.subr.bf16.mxu1 %v1286_v14  ;;  %v107_v32 = vpack.c.bf16 %v100_v31, %v100_v31  ;;  %v108_v41 = vpack.c.bf16 %v101_v40, %v101_v40  ;;  %v1306_v42 = vld [vmem:[#allocation4 + $0x148] sm:$0xff]   ;;  %v1308_v45 = vld [vmem:[#allocation4 + $0x150] sm:$0xff]   ;;  %v1310_v47 = vld [vmem:[#allocation4 + $0x158] sm:$0xff]  }
  0x66   :  { %1109 = vmatpush3.bf16.msra.mxu0 %v1285_v13  ;;  %588 = vmatprep.mubr.bf16.mxu1 %v109_v38  ;;  %v1307_v43 = vld [vmem:[#allocation4 + $0x108] sm:$0xff]   ;;  %v1309_v46 = vld [vmem:[#allocation4 + $0x110] sm:$0xff]   ;;  %v1311_v48 = vld [vmem:[#allocation4 + $0x118] sm:$0xff]  }
  0x67   :  { %1110 = vmatprep.subr.bf16.mxu0 %v1288_v16  ;;  %548 = vmatprep.mubr.bf16.mxu0 %v107_v32  ;;  %v1312_v49 = vld [vmem:[#allocation4 + $0x160] sm:$0xff]   ;;  %v1314_v51 = vld [vmem:[#allocation4 + $0x168] sm:$0xff]   ;;  %v104_v54 = vld [vmem:[#allocation2 + $0x28] sm:$0xff] }
  0x68   :  { %1131 = vmatpush3.bf16.msra.mxu1 %v1287_v15  ;;  %v1313_v50 = vld [vmem:[#allocation4 + $0x120] sm:$0xff]   ;;  %v1315_v52 = vld [vmem:[#allocation4 + $0x128] sm:$0xff]   ;;  %v1316_v55 = vld [vmem:[#allocation4 + $0x170] sm:$0xff]   ;;  %v111_v56 = vpack.c.bf16 %v104_v54, %v104_v54 }
  0x69   :  { %1132 = vmatprep.subr.bf16.mxu1 %v1290_v18  ;;  %v1320_v53 = vld [vmem:[#allocation4 + $0x180] sm:$0xff]   ;;  %v105_v57 = vld [vmem:[#allocation2 + $0x30] sm:$0xff]  ;;  %v1317_v59 = vld [vmem:[#allocation4 + $0x130] sm:$0xff]  }
  0x6a   :  { %1111 = vmatpush3.bf16.msra.mxu0 %v1289_v17  ;;  %v112_v58 = vpack.c.bf16 %v105_v57, %v105_v57  ;;  %v1318_v60 = vld [vmem:[#allocation4 + $0x178] sm:$0xff]   ;;  %v103_v62 = vld [vmem:[#allocation2 + $0x20] sm:$0xff]  ;;  %v1322_v1 = vld [vmem:[#allocation6 + $0x8] sm:$0xff]  }
  0x6b   :  { %1112 = vmatprep.subr.bf16.mxu0 %v1292_v20  ;;  %v1319_v61 = vld [vmem:[#allocation4 + $0x138] sm:$0xff]   ;;  %v110_v63 = vpack.c.bf16 %v103_v62, %v103_v62  ;;  %v1321_v0 = vld [vmem:[#allocation6] sm:$0xff]   ;;  %v1324_v3 = vld [vmem:[#allocation6 + $0x18] sm:$0xff]  }
  0x6c   :  { %1133 = vmatpush3.bf16.msra.mxu1 %v1291_v19  ;;  %v1323_v2 = vld [vmem:[#allocation6 + $0x10] sm:$0xff]   ;;  %v1325_v4 = vld [vmem:[#allocation6 + $0x20] sm:$0xff]   ;;  %v1326_v5 = vld [vmem:[#allocation6 + $0x28] sm:$0xff]  }
  0x6d   :  { %1134 = vmatprep.subr.bf16.mxu1 %v1294_v22  ;;  %v1327_v6 = vld [vmem:[#allocation6 + $0x30] sm:$0xff]   ;;  %v1328_v7 = vld [vmem:[#allocation6 + $0x38] sm:$0xff]   ;;  %v1329_v8 = vld [vmem:[#allocation7] sm:$0xff]  }
  0x6e   :  { %1113 = vmatpush3.bf16.msra.mxu0 %v1293_v21  ;;  %v1330_v9 = vld [vmem:[#allocation7 + $0x8] sm:$0xff]   ;;  %v1331_v10 = vld [vmem:[#allocation7 + $0x10] sm:$0xff]   ;;  %v1332_v11 = vld [vmem:[#allocation7 + $0x18] sm:$0xff]  }
  0x6f   :  { %1114 = vmatprep.subr.bf16.mxu0 %v1296_v24  ;;  %v1333_v12 = vld [vmem:[#allocation7 + $0x20] sm:$0xff]   ;;  %v1334_v13 = vld [vmem:[#allocation7 + $0x28] sm:$0xff]   ;;  %v1335_v40 = vld [vmem:[#allocation7 + $0x30] sm:$0xff]  }
  0x70   :  { %1135 = vmatpush3.bf16.msra.mxu1 %v1295_v23  ;;  %v1024_v15 = vld [vmem:[%s1642_s2] ss:$0 sm:$0xff]  ;;  %v1343_v57 = vld [vmem:[#allocation9 + $0x30] sm:$0xff]  }
  0x71   :  { %1136 = vmatprep.subr.bf16.mxu1 %v1298_v26 }
  0x72   :  { %1115 = vmatpush3.bf16.msra.mxu0 %v1297_v25 }
  0x73   :  { %1116 = vmatprep.subr.bf16.mxu0 %v1300_v28 }
  0x74   :  { %1137 = vmatpush3.bf16.msra.mxu1 %v1299_v27 }
  0x75   :  { %1138 = vmatprep.subr.bf16.mxu1 %v1302_v30 }
  0x76   :  { %1117 = vmatpush3.bf16.msra.mxu0 %v1301_v29 }
  0x77   :  { %1146 = vmatprep.subr.bf16.mxu0 %v1304_v36 }
  0x78   :  { %1139 = vmatpush3.bf16.msra.mxu1 %v1303_v33 }
  0x79   :  { %549 = vmatmul.mubr.bf16.vlgmr.msra.gmra.mrb[0].mxu0 %v106_v35  ;;  %1197 = vmatprep.subr.bf16.mxu1 %v1468_v44 }
  0x7a   :  { %1147 = vmatpush3.bf16.msra.mxu0 %v1305_v39  ;;  %628 = vmatprep.mubr.bf16.mxu0 %v111_v56 }
  0x7b   :  { %589 = vmatmul.mubr.bf16.vlgmr.msra.gmra.mrb[0].mxu1 %v108_v41  ;;  %1148 = vmatprep.subr.bf16.mxu0 %v1306_v42  ;;  %v1336_v41 = vld [vmem:[#allocation7 + $0x38] sm:$0xff]   ;;  %v1337_v42 = vld [vmem:[#allocation9] sm:$0xff]  }
  0x7c   :  { %1199 = vmatprep.mubr.msk.bf16.mxu1 %vm1469_vm0, %v1468_v44  ;;  %1198 = vmatpush3.bf16.msra.mxu1 %v1320_v53 }
  0x7d   :  { %1203 = vmatprep.subr.bf16.mxu1 %v1468_v44 }
  0x7e   :  { %1149 = vmatpush3.bf16.msra.mxu0 %v1307_v43  ;;  %v1338_v43 = vld [vmem:[#allocation9 + $0x8] sm:$0xff]  }
  0x7f   :  { %1150 = vmatprep.subr.bf16.mxu0 %v1308_v45  ;;  %v1339_v45 = vld [vmem:[#allocation9 + $0x10] sm:$0xff]  }
  0x82   :  { %1151 = vmatpush3.bf16.msra.mxu0 %v1309_v46  ;;  %v1340_v46 = vld [vmem:[#allocation9 + $0x18] sm:$0xff]  }
  0x83   :  { %1152 = vmatprep.subr.bf16.mxu0 %v1310_v47  ;;  %1200 = vmatmul.mubr.msk.bf16.vlgmr.msra.gmra.mrb[4].mxu1 %vm512_vm1, %v112_v58  ;;  %v1341_v47 = vld [vmem:[#allocation9 + $0x20] sm:$0xff]   ;;  %v1344_v58 = vld [vmem:[#allocation9 + $0x38] sm:$0xff]  }
  0x84   :  { %1219 = vmatprep.mubr.msk.bf16.mxu1 %vm1469_vm0, %v1468_v44  ;;  %1204 = vmatpush3.bf16.msra.mxu1 %v1321_v0 }
  0x85   :  { %1205 = vmatprep.subr.bf16.mxu1 %v1468_v44 }
  0x86   :  { %1153 = vmatpush3.bf16.msra.mxu0 %v1311_v48  ;;  %v1342_v48 = vld [vmem:[#allocation9 + $0x28] sm:$0xff]  }
  0x87   :  { %1154 = vmatprep.subr.bf16.mxu0 %v1312_v49  ;;  %v1075_v49 = vld [vmem:[%s1644_s4] ss:$0 sm:$0xff] }
  0x88   :  { %1206 = vmatpush3.bf16.msra.mxu1 %v1322_v1 }
  0x89   :  { %1207 = vmatprep.subr.bf16.mxu1 %v1468_v44 }
  0x8a   :  { %1155 = vmatpush3.bf16.msra.mxu0 %v1313_v50 }
  0x8b   :  { %1156 = vmatprep.subr.bf16.mxu0 %v1314_v51 }
  0x8c   :  { %1208 = vmatpush3.bf16.msra.mxu1 %v1323_v2 }
  0x8d   :  { %1209 = vmatprep.subr.bf16.mxu1 %v1468_v44 }
  0x8e   :  { %1157 = vmatpush3.bf16.msra.mxu0 %v1315_v52 }
  0x8f   :  { %1158 = vmatprep.subr.bf16.mxu0 %v1316_v55 }
  0x90   :  { %1210 = vmatpush3.bf16.msra.mxu1 %v1324_v3  ;;  %v1093_v3 = vld [vmem:[%s1648_s8] ss:$0 sm:$0xff] }
  0x91   :  { %1211 = vmatprep.subr.bf16.mxu1 %v1468_v44 }
  0x92   :  { %1159 = vmatpush3.bf16.msra.mxu0 %v1317_v59  ;;  %v1084_v59 = vld [vmem:[%s1646_s6] ss:$0 sm:$0xff] }
  0x93   :  { %1160 = vmatprep.subr.bf16.mxu0 %v1318_v60 }
  0x94   :  { %1212 = vmatpush3.bf16.msra.mxu1 %v1325_v4 }
  0x95   :  { %1213 = vmatprep.subr.bf16.mxu1 %v1468_v44 }
  0x96   :  { %1161 = vmatpush3.bf16.msra.mxu0 %v1319_v61 }
  0x97   :  { %1223 = vmatprep.subr.bf16.mxu0 %v1468_v44 }
  0x98   :  { %1214 = vmatpush3.bf16.msra.mxu1 %v1326_v5 }
  0x99   :  { %629 = vmatmul.mubr.bf16.vlgmr.msra.gmra.mrb[4].mxu0 %v110_v63  ;;  %1215 = vmatprep.subr.bf16.mxu1 %v1468_v44 }
  0x9a   :  { %1239 = vmatprep.mubr.msk.bf16.mxu0 %vm1469_vm0, %v1468_v44  ;;  %1224 = vmatpush3.bf16.msra.mxu0 %v1329_v8 }
  0x9b   :  { %1225 = vmatprep.subr.bf16.mxu0 %v1468_v44 }
  0x9c   :  { %1216 = vmatpush3.bf16.msra.mxu1 %v1327_v6 }
  0x9d   :  { %1217 = vmatprep.subr.bf16.mxu1 %v1468_v44 }
  0x9e   :  { %1226 = vmatpush3.bf16.msra.mxu0 %v1330_v9 }
  0x9f   :  { %1227 = vmatprep.subr.bf16.mxu0 %v1468_v44 }
  0xa0   :  { %1218 = vmatpush3.bf16.msra.mxu1 %v1328_v7 }
  0xa1   :  { %1243 = vmatprep.subr.bf16.mxu1 %v1468_v44 }
  0xa2   :  { %1228 = vmatpush3.bf16.msra.mxu0 %v1331_v10 }
  0xa3   :  { %1229 = vmatprep.subr.bf16.mxu0 %v1468_v44 }
  0xa6   :  { %1230 = vmatpush3.bf16.msra.mxu0 %v1332_v11 }
  0xa7   :  { %1231 = vmatprep.subr.bf16.mxu0 %v1468_v44 }
  0xaa   :  { %1232 = vmatpush3.bf16.msra.mxu0 %v1333_v12 }
  0xab   :  { %1233 = vmatprep.subr.bf16.mxu0 %v1468_v44 }
  0xae   :  { %1234 = vmatpush3.bf16.msra.mxu0 %v1334_v13 }
  0xaf   :  { %1235 = vmatprep.subr.bf16.mxu0 %v1468_v44 }
  0xb2   :  { %1236 = vmatpush3.bf16.msra.mxu0 %v1335_v40 }
  0xb3   :  { %1237 = vmatprep.subr.bf16.mxu0 %v1468_v44 }
  0xb6   :  { %1238 = vmatpush3.bf16.msra.mxu0 %v1336_v41 }
 0x14c   :  { %v1118_v14 = vpop.f32.mrb[0].mxu0 }
 0x14d   :  { %v1119_v16 = vpop.f32.mrb[1].mxu0 }
 0x14e   :  { %v1120_v17 = vadd.f32 %v1119_v16, %v1118_v14  ;;  %v1121_v18 = vpop.f32.mrb[2].mxu0  ;;  %v1140_v19 = vpop.f32.mrb[0].mxu1 }
 0x14f   :  { %v1122_v20 = vpop.f32.mrb[3].mxu0  ;;  %v1141_v22 = vpop.f32.mrb[1].mxu1 }
 0x150   :  { %v551_v21 = vadd.f32 %v1120_v17, %v1024_v15  ;;  %v1142_v23 = vadd.f32 %v1141_v22, %v1140_v19  ;;  %v1143_v24 = vpop.f32.mrb[2].mxu1 }
 0x151   :  { %v1144_v25 = vpop.f32.mrb[3].mxu1 }
 0x152   :  { %v591_v26 = vadd.f32 %v1142_v23, %v551_v21 }
 0x156   :  { %v670_v27 = vpop.f32.mrb[4].mxu1 }
 0x157   :  { %v1201_v28 = vpop.f32.mrb[5].mxu1 }
 0x158   :  { %v673_v29 = vpop.f32.mrb[6].mxu1 }
 0x159   :  { %v1202_v30 = vpop.f32.mrb[7].mxu1 }
 0x16c   :  { %v1162_v31 = vpop.f32.mrb[4].mxu0 }
 0x16d   :  { %v1163_v32 = vpop.f32.mrb[5].mxu0 }
 0x16e   :  { %v1164_v33 = vadd.f32 %v1163_v32, %v1162_v31  ;;  %v1165_v34 = vpop.f32.mrb[6].mxu0 }
 0x16f   :  { %v1166_v35 = vpop.f32.mrb[7].mxu0 }
 0x170   :  { %v631_v36 = vadd.f32 %v1164_v33, %v591_v26 }
 0x172   :  { %v671_v37 = vadd.f32 %v670_v27, %v631_v36 }
 0x174   :  { %v676_v38 = vmax.f32 %v671_v37, 0.0 }
 0x176   :  { %v677_v39 = vpack.c.bf16 %v676_v38, %v676_v38 }
 0x178   :  { %1220 = vmatmul.mubr.bf16.vlgmr.msra.gmra.mrb[8].mxu1 %v677_v39 }
 0x179   :  { %1259 = vmatprep.mubr.msk.bf16.mxu1 %vm1469_vm0, %v1468_v44  ;;  %1244 = vmatpush3.bf16.msra.mxu1 %v1337_v42 }
 0x17a   :  { %1245 = vmatprep.subr.bf16.mxu1 %v1468_v44 }
 0x17d   :  { %1246 = vmatpush3.bf16.msra.mxu1 %v1338_v43 }
 0x17e   :  { %1247 = vmatprep.subr.bf16.mxu1 %v1468_v44 }
 0x181   :  { %1248 = vmatpush3.bf16.msra.mxu1 %v1339_v45 }
 0x182   :  { %1249 = vmatprep.subr.bf16.mxu1 %v1468_v44 }
 0x185   :  { %1250 = vmatpush3.bf16.msra.mxu1 %v1340_v46 }
 0x186   :  { %1251 = vmatprep.subr.bf16.mxu1 %v1468_v44 }
 0x189   :  { %1252 = vmatpush3.bf16.msra.mxu1 %v1341_v47 }
 0x18a   :  { %1253 = vmatprep.subr.bf16.mxu1 %v1468_v44 }
 0x18d   :  { %1254 = vmatpush3.bf16.msra.mxu1 %v1342_v48 }
 0x18e   :  { %1255 = vmatprep.subr.bf16.mxu1 %v1468_v44 }
 0x191   :  { %1256 = vmatpush3.bf16.msra.mxu1 %v1343_v57 }
 0x192   :  { %1257 = vmatprep.subr.bf16.mxu1 %v1468_v44 }
 0x195   :  { %1258 = vmatpush3.bf16.msra.mxu1 %v1344_v58 }
 0x24b   :  { %v783_v50 = vpop.f32.mrb[8].mxu1 }
 0x24c   :  { %v784_v51 = vadd.f32 %v1075_v49, %v783_v50  ;;  %v1221_v52 = vpop.f32.mrb[9].mxu1 }
 0x24d   :  { %v786_v53 = vpop.f32.mrb[10].mxu1 }
 0x24e   :  { %v789_v54 = vmax.f32 %v784_v51, 0.0  ;;  %v1222_v55 = vpop.f32.mrb[11].mxu1 }
 0x250   :  { %v790_v56 = vpack.c.bf16 %v789_v54, %v789_v54 }
 0x252   :  { %1240 = vmatmul.mubr.bf16.vlgmr.msra.gmra.mrb[8].mxu0 %v790_v56 }
 0x325   :  { %v896_v60 = vpop.f32.mrb[8].mxu0 }
 0x326   :  { %v897_v61 = vadd.f32 %v1084_v59, %v896_v60  ;;  %v1241_v62 = vpop.f32.mrb[9].mxu0 }
 0x327   :  { %v899_v63 = vpop.f32.mrb[10].mxu0 }
 0x328   :  { %v902_v0 = vmax.f32 %v897_v61, 0.0  ;;  %v1242_v1 = vpop.f32.mrb[11].mxu0 }
 0x32a   :  { %v903_v2 = vpack.c.bf16 %v902_v0, %v902_v0 }
 0x32c   :  { %1260 = vmatmul.mubr.bf16.vlgmr.msra.gmra.mrb[12].mxu1 %v903_v2 }
 0x3ff   :  { %v1009_v4 = vpop.f32.mrb[12].mxu1 }
 0x400   :  { %v1010_v44 = vadd.f32 %v1093_v3, %v1009_v4  ;;  %v1261_v5 = vpop.f32.mrb[13].mxu1 }
 0x401   :  { %v1012_v6 = vpop.f32.mrb[14].mxu1 }
 0x402   :  { %v1015_v7 = vpack.c.bf16 %v1010_v44, %v1010_v44  ;;  %v1262_v8 = vpop.f32.mrb[15].mxu1 }
 0x404   :  { %1016 = vst [vmem:[%s1649_s9] sm:$0xf] %v1015_v7 }
 0x405   :  { %1021 = vsyncpa [#allocation3], 1 }
 0x406   :  { %1022 = vsyncpa [#allocation5], 1 }
 0x407   :  { %1023 = vsyncpa [#allocation8], 1 }

</bundles_post_ra>
